<compile_context>
chip_gen: v7x
topology: tpu7x:2x2x1
jax: 0.10.0
libtpu: 0.0.40
codegen_flags: <defaults>
</compile_context>

<pallas_src>
import jax
import jax.numpy as jnp
from jax.experimental import pallas as pl
from jax.experimental.pallas import tpu as pltpu


def _mlp_kernel(x_ref, w1_ref, w2_ref, w3_ref, w4_ref, w5_ref, b_ref, out_ref):
    f32 = jnp.float32
    bf16 = jnp.bfloat16
    relu = lambda t: jnp.maximum(t, 0.0)

    def branch(c):
        # 256(pad of 196) -> 256 -> 128 -> 128(pad of 10), ReLU after each layer.
        xin = x_ref[:, 256 * c:256 * (c + 1)]                 # (Bt, 256) bf16
        h = jnp.dot(xin, w1_ref[c], preferred_element_type=f32)
        h = relu(h + b_ref[c:c + 1, :])                       # (Bt, 256)
        h = jnp.dot(h.astype(bf16), w2_ref[c], preferred_element_type=f32)
        h = relu(h + b_ref[2 + c:3 + c, :128])                # (Bt, 128)
        h = jnp.dot(h.astype(bf16), w3_ref[c], preferred_element_type=f32)
        h = relu(h + b_ref[4 + c:5 + c, :128])                # (Bt, 128), cols >= 10 are 0
        return h

    u = branch(0)
    v = branch(1)

    # head: cat([u, v], 1) @ W4 + b4 as a single K=256 MXU dot. u / v are each
    # exactly one 128-lane tile so the concat is pure vreg placement; W4 rows
    # 0..9 carry the u-part, rows 128..137 the v-part, everything else is zero.
    uv = jnp.concatenate([u, v], axis=-1)                     # (Bt, 256) f32
    h = jnp.dot(uv.astype(bf16), w4_ref[...], preferred_element_type=f32)
    h = relu(h + b_ref[6:7, :128])                            # (Bt, 128)

    # final: 100(padded to 128) -> 2(padded to 8), no activation. Slim f32 store.
    out_ref[...] = (jnp.dot(h.astype(bf16), w5_ref[...], preferred_element_type=f32)
                    + b_ref[7:8, :8])                         # (Bt, 8)


def pack_params(params):
    """Pack the 16 torch-layout params (weights stored as (in, out), biases as
    (1, out)) into 6 padded / bf16 kernel arrays.  Call once, reuse per forward."""
    (w11, b11, w21, b21, w31, b31,
     w12, b12, w22, b22, w32, b32,
     w4, b4, w5, b5) = params

    # Paddings below are hard-coded for nb_hidden1=256, nb_hidden4=100.
    assert w11.shape == (196, 256) and w12.shape == (196, 256), (w11.shape, w12.shape)
    assert w21.shape == (256, 128) and w22.shape == (256, 128), (w21.shape, w22.shape)
    assert w31.shape == (128, 10) and w32.shape == (128, 10), (w31.shape, w32.shape)
    assert w4.shape == (20, 100) and w5.shape == (100, 2), (w4.shape, w5.shape)

    def padw(w, k, n):
        return jnp.pad(w, ((0, k - w.shape[0]), (0, n - w.shape[1])))

    def padb(b):
        b = b.reshape(-1)
        return jnp.pad(b, (0, 256 - b.shape[0]))

    W1 = jnp.stack([padw(w11, 256, 256), padw(w12, 256, 256)]).astype(jnp.bfloat16)
    W2 = jnp.stack([padw(w21, 256, 128), padw(w22, 256, 128)]).astype(jnp.bfloat16)
    W3 = jnp.stack([padw(w31, 128, 128), padw(w32, 128, 128)]).astype(jnp.bfloat16)

    # Single (256, 128) head weight for the concat([u, v]) layout.
    W4 = jnp.zeros((256, 128), jnp.float32)
    W4 = W4.at[:10, :100].set(w4[:10])
    W4 = W4.at[128:138, :100].set(w4[10:])
    W4 = W4.astype(jnp.bfloat16)

    W5 = padw(w5, 128, 8).astype(jnp.bfloat16)                # (128, 8)

    # bias table rows: [b1_1, b1_2, b2_1, b2_2, b3_1, b3_2, b4, b5], padded to 256.
    BT = jnp.stack([padb(b11), padb(b12), padb(b21), padb(b22),
                    padb(b31), padb(b32), padb(b4), padb(b5)]).astype(jnp.float32)
    return (W1, W2, W3, W4, W5, BT)


def _round_up(n, m):
    return -(-n // m) * m


def mlp_forward(x, packed):
    """x: [B, 2, 14, 14] float32 (NCHW). packed: output of pack_params.
    Returns [B, 2] float32 logits."""
    W1, W2, W3, W4, W5, BT = packed
    B = x.shape[0]

    # Batch tile: multiple of 16 (bf16 sublane packing), capped at 1024, and
    # chosen so the grid has >= 2 steps when B allows it (v7x: both TCs busy).
    # VMEM at bt=1024: weights ~0.5 MB + 2x (bt,512) bf16 input + (bt,8) f32
    # output -- a few MB, far below even v7x's 32 MiB scoped default.
    bt = min(1024, max(16, _round_up(-(-B // 2), 16)))
    bp = _round_up(B, bt)
    n_steps = bp // bt

    # Contiguous (Bp, 512) input slab: [u | v] per row, produced by pad+reshape
    # (no transpose, no extra materialized HBM pass).
    xuv = x.reshape(B, 2, 196)
    xuv = jnp.pad(xuv, ((0, 0), (0, 0), (0, 256 - 196)))      # (B, 2, 256)
    xuv = xuv.reshape(B, 512)
    xuv = jnp.pad(xuv, ((0, bp - B), (0, 0))).astype(jnp.bfloat16)

    weight_bytes = sum(int(w.size) * w.dtype.itemsize for w in (W1, W2, W3, W4, W5, BT))
    cost = pl.CostEstimate(
        flops=2 * 263_168 * bp,            # padded MACs/sample * 2
        transcendentals=0,
        bytes_accessed=bp * (512 * 2 + 8 * 4) + weight_bytes,
    )

    out = pl.pallas_call(
        _mlp_kernel,
        out_shape=jax.ShapeDtypeStruct((bp, 8), jnp.float32),
        grid=(n_steps,),
        in_specs=[
            pl.BlockSpec((bt, 512), lambda i: (i, 0)),        # activations: batch-tiled
            pl.BlockSpec(W1.shape, lambda i: (0, 0, 0)),      # weights: VMEM-resident
            pl.BlockSpec(W2.shape, lambda i: (0, 0, 0)),
            pl.BlockSpec(W3.shape, lambda i: (0, 0, 0)),
            pl.BlockSpec(W4.shape, lambda i: (0, 0)),
            pl.BlockSpec(W5.shape, lambda i: (0, 0)),
            pl.BlockSpec(BT.shape, lambda i: (0, 0)),
        ],
        out_specs=pl.BlockSpec((bt, 8), lambda i: (i, 0)),
        compiler_params=pltpu.CompilerParams(
            dimension_semantics=("parallel",)),               # v7x: 2 TCs split the batch
        cost_estimate=cost,
    )(xuv, W1, W2, W3, W4, W5, BT)

    return out[:B, :2]


def init_params(key, nb_hidden1=256, nb_hidden4=100):
    """Deterministic init mimicking nn.Linear's U(-1/sqrt(fan_in), 1/sqrt(fan_in)).
    Weights stored as (in_features, out_features); biases as (1, out_features)."""
    h2 = nb_hidden1 // 2
    dims = [
        (196, nb_hidden1),   # fc1_1
        (nb_hidden1, h2),    # fc2_1
        (h2, 10),            # fc3_1
        (196, nb_hidden1),   # fc1_2
        (nb_hidden1, h2),    # fc2_2
        (h2, 10),            # fc3_2
        (20, nb_hidden4),    # fc4
        (nb_hidden4, 2),     # fc5
    ]
    params = []
    for fan_in, fan_out in dims:
        key, kw, kb = jax.random.split(key, 3)
        bound = 1.0 / (fan_in ** 0.5)
        w = jax.random.uniform(kw, (fan_in, fan_out), jnp.float32, -bound, bound)
        b = jax.random.uniform(kb, (1, fan_out), jnp.float32, -bound, bound)
        params += [w, b]
    return tuple(params)


if __name__ == "__main__":
    key = jax.random.PRNGKey(0)
    kx, kp = jax.random.split(key)

    B = 2
    x = jax.random.normal(kx, (B, 2, 14, 14), dtype=jnp.float32)
    params = init_params(kp)
    packed = pack_params(params)

    out = mlp_forward(x, packed)
    out = jax.block_until_ready(out)
    assert out.shape == (B, 2), out.shape

    # Pure-JAX reference with identical bf16-operand / f32-accumulate numerics.
    (w11, b11, w21, b21, w31, b31,
     w12, b12, w22, b22, w32, b32,
     w4, b4, w5, b5) = params
    bf16, f32 = jnp.bfloat16, jnp.float32
    relu = lambda t: jnp.maximum(t, 0.0)
    lin = lambda a, w, b: jnp.dot(a.astype(bf16), w.astype(bf16),
                                  preferred_element_type=f32) + b
    u = x[:, 0].reshape(B, 196)
    v = x[:, 1].reshape(B, 196)
    u = relu(lin(u, w11, b11)); u = relu(lin(u, w21, b21)); u = relu(lin(u, w31, b31))
    v = relu(lin(v, w12, b12)); v = relu(lin(v, w22, b22)); v = relu(lin(v, w32, b32))
    h = relu(lin(jnp.concatenate([u, v], axis=1), w4, b4))
    ref = lin(h, w5, b5)
    assert jnp.allclose(out, ref, atol=1e-2, rtol=1e-2), (out, ref)

    print("KERNEL_OK")
</pallas_src>

<mosaic_0001>
module attributes {stable_mosaic.version = 11 : i64} {
  func.func @_mlp_kernel(%arg0: i32, %arg1: memref<16x512xbf16, #tpu.memory_space<vmem>>, %arg2: memref<2x256x256xbf16, #tpu.memory_space<vmem>>, %arg3: memref<2x256x128xbf16, #tpu.memory_space<vmem>>, %arg4: memref<2x128x128xbf16, #tpu.memory_space<vmem>>, %arg5: memref<256x128xbf16, #tpu.memory_space<vmem>>, %arg6: memref<128x8xbf16, #tpu.memory_space<vmem>>, %arg7: memref<8x256xf32, #tpu.memory_space<vmem>>, %arg8: memref<16x8xf32, #tpu.memory_space<vmem>>) attributes {dimension_semantics = [#tpu.dimension_semantics<parallel>], iteration_bounds = array<i64: 1>, scalar_prefetch = 0 : i64, scratch_operands = 0 : i64, tpu.core_type = #tpu.core_type<tc>, window_params = [{transform_indices = @transform_0, window_bounds = array<i64: 16, 512>}, {pipeline_mode = #tpu.pipeline_mode<synchronous>, transform_indices = @transform_1, window_bounds = array<i64: 2, 256, 256>}, {pipeline_mode = #tpu.pipeline_mode<synchronous>, transform_indices = @transform_2, window_bounds = array<i64: 2, 256, 128>}, {pipeline_mode = #tpu.pipeline_mode<synchronous>, transform_indices = @transform_3, window_bounds = array<i64: 2, 128, 128>}, {pipeline_mode = #tpu.pipeline_mode<synchronous>, transform_indices = @transform_4, window_bounds = array<i64: 256, 128>}, {pipeline_mode = #tpu.pipeline_mode<synchronous>, transform_indices = @transform_5, window_bounds = array<i64: 128, 8>}, {pipeline_mode = #tpu.pipeline_mode<synchronous>, transform_indices = @transform_6, window_bounds = array<i64: 8, 256>}, {transform_indices = @transform_7, window_bounds = array<i64: 16, 8>}]} {
    %c0 = arith.constant 0 : index
    %c0_0 = arith.constant 0 : index
    %0 = vector.load %arg1[%c0, %c0_0] : memref<16x512xbf16, #tpu.memory_space<vmem>>, vector<16x256xbf16>
    %c0_1 = arith.constant 0 : index
    %c0_2 = arith.constant 0 : index
    %c0_3 = arith.constant 0 : index
    %1 = vector.load %arg2[%c0_1, %c0_2, %c0_3] : memref<2x256x256xbf16, #tpu.memory_space<vmem>>, vector<1x256x256xbf16>
    %2 = vector.shape_cast %1 : vector<1x256x256xbf16> to vector<256x256xbf16>
    %cst = arith.constant dense<0.000000e+00> : vector<16x256xf32>
    %3 = tpu.matmul %0, %2, %cst {dimension_numbers = #tpu.dot_dimension_numbers<[1], [0], [0], [1], [0, 0, 1, 1], [], []>} : vector<16x256xbf16>, vector<256x256xbf16>, vector<16x256xf32> -> vector<16x256xf32>
    %c0_4 = arith.constant 0 : index
    %c0_5 = arith.constant 0 : index
    %4 = vector.load %arg7[%c0_4, %c0_5] : memref<8x256xf32, #tpu.memory_space<vmem>>, vector<1x256xf32>
    %5 = vector.broadcast %4 : vector<1x256xf32> to vector<16x256xf32>
    %6 = arith.addf %3, %5 : vector<16x256xf32>
    %cst_6 = arith.constant 0.000000e+00 : f32
    %7 = vector.broadcast %cst_6 : f32 to vector<16x256xf32>
    %8 = arith.maximumf %6, %7 : vector<16x256xf32>
    %9 = arith.truncf %8 : vector<16x256xf32> to vector<16x256xbf16>
    %c0_7 = arith.constant 0 : index
    %c0_8 = arith.constant 0 : index
    %c0_9 = arith.constant 0 : index
    %10 = vector.load %arg3[%c0_7, %c0_8, %c0_9] : memref<2x256x128xbf16, #tpu.memory_space<vmem>>, vector<1x256x128xbf16>
    %11 = vector.shape_cast %10 : vector<1x256x128xbf16> to vector<256x128xbf16>
    %cst_10 = arith.constant dense<0.000000e+00> : vector<16x128xf32>
    %12 = tpu.matmul %9, %11, %cst_10 {dimension_numbers = #tpu.dot_dimension_numbers<[1], [0], [0], [1], [0, 0, 1, 1], [], []>} : vector<16x256xbf16>, vector<256x128xbf16>, vector<16x128xf32> -> vector<16x128xf32>
    %c2 = arith.constant 2 : index
    %c0_11 = arith.constant 0 : index
    %13 = vector.load %arg7[%c2, %c0_11] : memref<8x256xf32, #tpu.memory_space<vmem>>, vector<1x128xf32>
    %14 = vector.broadcast %13 : vector<1x128xf32> to vector<16x128xf32>
    %15 = arith.addf %12, %14 : vector<16x128xf32>
    %cst_12 = arith.constant 0.000000e+00 : f32
    %16 = vector.broadcast %cst_12 : f32 to vector<16x128xf32>
    %17 = arith.maximumf %15, %16 : vector<16x128xf32>
    %18 = arith.truncf %17 : vector<16x128xf32> to vector<16x128xbf16>
    %c0_13 = arith.constant 0 : index
    %c0_14 = arith.constant 0 : index
    %c0_15 = arith.constant 0 : index
    %19 = vector.load %arg4[%c0_13, %c0_14, %c0_15] : memref<2x128x128xbf16, #tpu.memory_space<vmem>>, vector<1x128x128xbf16>
    %20 = vector.shape_cast %19 : vector<1x128x128xbf16> to vector<128x128xbf16>
    %cst_16 = arith.constant dense<0.000000e+00> : vector<16x128xf32>
    %21 = tpu.matmul %18, %20, %cst_16 {dimension_numbers = #tpu.dot_dimension_numbers<[1], [0], [0], [1], [0, 0, 1, 1], [], []>} : vector<16x128xbf16>, vector<128x128xbf16>, vector<16x128xf32> -> vector<16x128xf32>
    %c4 = arith.constant 4 : index
    %c0_17 = arith.constant 0 : index
    %22 = vector.load %arg7[%c4, %c0_17] : memref<8x256xf32, #tpu.memory_space<vmem>>, vector<1x128xf32>
    %23 = vector.broadcast %22 : vector<1x128xf32> to vector<16x128xf32>
    %24 = arith.addf %21, %23 : vector<16x128xf32>
    %cst_18 = arith.constant 0.000000e+00 : f32
    %25 = vector.broadcast %cst_18 : f32 to vector<16x128xf32>
    %26 = arith.maximumf %24, %25 : vector<16x128xf32>
    %c0_19 = arith.constant 0 : index
    %c256 = arith.constant 256 : index
    %27 = vector.load %arg1[%c0_19, %c256] : memref<16x512xbf16, #tpu.memory_space<vmem>>, vector<16x256xbf16>
    %c1 = arith.constant 1 : index
    %c0_20 = arith.constant 0 : index
    %c0_21 = arith.constant 0 : index
    %28 = vector.load %arg2[%c1, %c0_20, %c0_21] : memref<2x256x256xbf16, #tpu.memory_space<vmem>>, vector<1x256x256xbf16>
    %29 = vector.shape_cast %28 : vector<1x256x256xbf16> to vector<256x256xbf16>
    %cst_22 = arith.constant dense<0.000000e+00> : vector<16x256xf32>
    %30 = tpu.matmul %27, %29, %cst_22 {dimension_numbers = #tpu.dot_dimension_numbers<[1], [0], [0], [1], [0, 0, 1, 1], [], []>} : vector<16x256xbf16>, vector<256x256xbf16>, vector<16x256xf32> -> vector<16x256xf32>
    %c1_23 = arith.constant 1 : index
    %c0_24 = arith.constant 0 : index
    %31 = vector.load %arg7[%c1_23, %c0_24] : memref<8x256xf32, #tpu.memory_space<vmem>>, vector<1x256xf32>
    %32 = vector.broadcast %31 : vector<1x256xf32> to vector<16x256xf32>
    %33 = arith.addf %30, %32 : vector<16x256xf32>
    %cst_25 = arith.constant 0.000000e+00 : f32
    %34 = vector.broadcast %cst_25 : f32 to vector<16x256xf32>
    %35 = arith.maximumf %33, %34 : vector<16x256xf32>
    %36 = arith.truncf %35 : vector<16x256xf32> to vector<16x256xbf16>
    %c1_26 = arith.constant 1 : index
    %c0_27 = arith.constant 0 : index
    %c0_28 = arith.constant 0 : index
    %37 = vector.load %arg3[%c1_26, %c0_27, %c0_28] : memref<2x256x128xbf16, #tpu.memory_space<vmem>>, vector<1x256x128xbf16>
    %38 = vector.shape_cast %37 : vector<1x256x128xbf16> to vector<256x128xbf16>
    %cst_29 = arith.constant dense<0.000000e+00> : vector<16x128xf32>
    %39 = tpu.matmul %36, %38, %cst_29 {dimension_numbers = #tpu.dot_dimension_numbers<[1], [0], [0], [1], [0, 0, 1, 1], [], []>} : vector<16x256xbf16>, vector<256x128xbf16>, vector<16x128xf32> -> vector<16x128xf32>
    %c3 = arith.constant 3 : index
    %c0_30 = arith.constant 0 : index
    %40 = vector.load %arg7[%c3, %c0_30] : memref<8x256xf32, #tpu.memory_space<vmem>>, vector<1x128xf32>
    %41 = vector.broadcast %40 : vector<1x128xf32> to vector<16x128xf32>
    %42 = arith.addf %39, %41 : vector<16x128xf32>
    %cst_31 = arith.constant 0.000000e+00 : f32
    %43 = vector.broadcast %cst_31 : f32 to vector<16x128xf32>
    %44 = arith.maximumf %42, %43 : vector<16x128xf32>
    %45 = arith.truncf %44 : vector<16x128xf32> to vector<16x128xbf16>
    %c1_32 = arith.constant 1 : index
    %c0_33 = arith.constant 0 : index
    %c0_34 = arith.constant 0 : index
    %46 = vector.load %arg4[%c1_32, %c0_33, %c0_34] : memref<2x128x128xbf16, #tpu.memory_space<vmem>>, vector<1x128x128xbf16>
    %47 = vector.shape_cast %46 : vector<1x128x128xbf16> to vector<128x128xbf16>
    %cst_35 = arith.constant dense<0.000000e+00> : vector<16x128xf32>
    %48 = tpu.matmul %45, %47, %cst_35 {dimension_numbers = #tpu.dot_dimension_numbers<[1], [0], [0], [1], [0, 0, 1, 1], [], []>} : vector<16x128xbf16>, vector<128x128xbf16>, vector<16x128xf32> -> vector<16x128xf32>
    %c5 = arith.constant 5 : index
    %c0_36 = arith.constant 0 : index
    %49 = vector.load %arg7[%c5, %c0_36] : memref<8x256xf32, #tpu.memory_space<vmem>>, vector<1x128xf32>
    %50 = vector.broadcast %49 : vector<1x128xf32> to vector<16x128xf32>
    %51 = arith.addf %48, %50 : vector<16x128xf32>
    %cst_37 = arith.constant 0.000000e+00 : f32
    %52 = vector.broadcast %cst_37 : f32 to vector<16x128xf32>
    %53 = arith.maximumf %51, %52 : vector<16x128xf32>
    %54 = tpu.concatenate %26, %53 in 1 : vector<16x128xf32>, vector<16x128xf32> -> vector<16x256xf32>
    %55 = arith.truncf %54 : vector<16x256xf32> to vector<16x256xbf16>
    %c0_38 = arith.constant 0 : index
    %c0_39 = arith.constant 0 : index
    %56 = vector.load %arg5[%c0_38, %c0_39] : memref<256x128xbf16, #tpu.memory_space<vmem>>, vector<256x128xbf16>
    %cst_40 = arith.constant dense<0.000000e+00> : vector<16x128xf32>
    %57 = tpu.matmul %55, %56, %cst_40 {dimension_numbers = #tpu.dot_dimension_numbers<[1], [0], [0], [1], [0, 0, 1, 1], [], []>} : vector<16x256xbf16>, vector<256x128xbf16>, vector<16x128xf32> -> vector<16x128xf32>
    %c6 = arith.constant 6 : index
    %c0_41 = arith.constant 0 : index
    %58 = vector.load %arg7[%c6, %c0_41] : memref<8x256xf32, #tpu.memory_space<vmem>>, vector<1x128xf32>
    %59 = vector.broadcast %58 : vector<1x128xf32> to vector<16x128xf32>
    %60 = arith.addf %57, %59 : vector<16x128xf32>
    %cst_42 = arith.constant 0.000000e+00 : f32
    %61 = vector.broadcast %cst_42 : f32 to vector<16x128xf32>
    %62 = arith.maximumf %60, %61 : vector<16x128xf32>
    %63 = arith.truncf %62 : vector<16x128xf32> to vector<16x128xbf16>
    %c0_43 = arith.constant 0 : index
    %c0_44 = arith.constant 0 : index
    %64 = vector.load %arg6[%c0_43, %c0_44] : memref<128x8xbf16, #tpu.memory_space<vmem>>, vector<128x8xbf16>
    %cst_45 = arith.constant dense<0.000000e+00> : vector<16x8xf32>
    %65 = tpu.matmul %63, %64, %cst_45 {dimension_numbers = #tpu.dot_dimension_numbers<[1], [0], [0], [1], [0, 0, 1, 1], [], []>} : vector<16x128xbf16>, vector<128x8xbf16>, vector<16x8xf32> -> vector<16x8xf32>
    %c7 = arith.constant 7 : index
    %c0_46 = arith.constant 0 : index
    %66 = vector.load %arg7[%c7, %c0_46] : memref<8x256xf32, #tpu.memory_space<vmem>>, vector<1x8xf32>
    %67 = vector.broadcast %66 : vector<1x8xf32> to vector<16x8xf32>
    %68 = arith.addf %65, %67 : vector<16x8xf32>
    %c0_47 = arith.constant 0 : index
    %c0_48 = arith.constant 0 : index
    %69 = vector.load %arg8[%c0_47, %c0_48] : memref<16x8xf32, #tpu.memory_space<vmem>>, vector<16x8xf32>
    tpu.vector_store %arg8[%c0_47, %c0_48], %68 {strides = array<i32>} : memref<16x8xf32, #tpu.memory_space<vmem>>, vector<16x8xf32>,
    return
  }
  func.func @transform_0(%arg0: i32) -> (i32, i32) {
    %c0_i32 = arith.constant 0 : i32
    %c0_i32_0 = arith.constant 0 : i32
    return %arg0, %c0_i32 : i32, i32
  }
  func.func @transform_1(%arg0: i32) -> (i32, i32, i32) {
    %c0_i32 = arith.constant 0 : i32
    %c0_i32_0 = arith.constant 0 : i32
    %c0_i32_1 = arith.constant 0 : i32
    %c0_i32_2 = arith.constant 0 : i32
    return %c0_i32, %c0_i32_0, %c0_i32_1 : i32, i32, i32
  }
  func.func @transform_2(%arg0: i32) -> (i32, i32, i32) {
    %c0_i32 = arith.constant 0 : i32
    %c0_i32_0 = arith.constant 0 : i32
    %c0_i32_1 = arith.constant 0 : i32
    %c0_i32_2 = arith.constant 0 : i32
    return %c0_i32, %c0_i32_0, %c0_i32_1 : i32, i32, i32
  }
  func.func @transform_3(%arg0: i32) -> (i32, i32, i32) {
    %c0_i32 = arith.constant 0 : i32
    %c0_i32_0 = arith.constant 0 : i32
    %c0_i32_1 = arith.constant 0 : i32
    %c0_i32_2 = arith.constant 0 : i32
    return %c0_i32, %c0_i32_0, %c0_i32_1 : i32, i32, i32
  }
  func.func @transform_4(%arg0: i32) -> (i32, i32) {
    %c0_i32 = arith.constant 0 : i32
    %c0_i32_0 = arith.constant 0 : i32
    %c0_i32_1 = arith.constant 0 : i32
    return %c0_i32, %c0_i32_0 : i32, i32
  }
  func.func @transform_5(%arg0: i32) -> (i32, i32) {
    %c0_i32 = arith.constant 0 : i32
    %c0_i32_0 = arith.constant 0 : i32
    %c0_i32_1 = arith.constant 0 : i32
    return %c0_i32, %c0_i32_0 : i32, i32
  }
  func.func @transform_6(%arg0: i32) -> (i32, i32) {
    %c0_i32 = arith.constant 0 : i32
    %c0_i32_0 = arith.constant 0 : i32
    %c0_i32_1 = arith.constant 0 : i32
    return %c0_i32, %c0_i32_0 : i32, i32
  }
  func.func @transform_7(%arg0: i32) -> (i32, i32) {
    %c0_i32 = arith.constant 0 : i32
    %c0_i32_0 = arith.constant 0 : i32
    return %arg0, %c0_i32 : i32, i32
  }
}

</mosaic_0001>

<bundles_post_ra>
// kernel: tpu_custom_call.1
= control target key start
LH: loop header
LB: loop body
LE: loop exit
PB: predicated region body
PF: predicated region fallthrough
CT: control target
= control target key end

     0   :  { %12 = vsyncpa [#allocation3], 0  ;;  %s2251_s0 = inlined_call_operand.vmem [shape: bf16[16,512], index: 0, kind: input, shape index: {}]   ;;  %s2252_s1 = inlined_call_operand.hbm [shape: bf16[2,256,256], index: 1, kind: input, shape index: {}]   ;;  %s2253_s2 = inlined_call_operand.hbm [shape: bf16[2,256,128], index: 2, kind: input, shape index: {}]   ;;  %s2254_s3 = inlined_call_operand.hbm [shape: bf16[2,128,128], index: 3, kind: input, shape index: {}]   ;;  %s2255_s4 = inlined_call_operand.hbm [shape: bf16[256,128], index: 4, kind: input, shape index: {}]   ;;  %s2256_s5 = inlined_call_operand.vmem [shape: bf16[128,8], index: 5, kind: input, shape index: {}]   ;;  %s2257_s6 = inlined_call_operand.vmem [shape: f32[8,256], index: 6, kind: input, shape index: {}]   ;;  %s2258_s7 = inlined_call_operand.vmem [shape: f32[16,8], index: 7, kind: output, shape index: {}]  }
   0x1   :  { %13 = vsyncpa [#allocation5], 0 }
   0x2   :  { %14 = vsyncpa [#allocation8], 0  ;;  %s2041_s24 = smov [#allocation4]   ;;  %s1947_s28 = scalar_lea.hbm %s2253_s2, 4096 }
   0x3   :  { %s34_s25 = sshll.u32 %s2041_s24, 4  ;;  %p1948_p0 = scmp.ne.s32.totalorder %s2253_s2, %s1947_s28  ;;  %s35_s25 = int_to_ptr.vmem [resolvable:$true] %s34_s25 }
   0x4   :  { %p1951_p1 = scmp.lt.u32.totalorder %s1947_s28, %s2253_s2 }
   0x6   :  { %p1953_p2 = pnand %p1951_p1, %p1948_p0 }
   0x8   :  { %1956 = shalt.err (!%p1953_p2)
}
   0x9   :  { %s1957_s10 = scalar_lea.vmem %s35_s25, 4096  ;;  %p1962_p4 = scmp.lt.s32.totalorder %s35_s25, %s35_s25 }
   0xa   :  { %p1958_p3 = scmp.ne.s32.totalorder %s35_s25, %s1957_s10  ;;  %p1963_p5 = scmp.lt.s32.totalorder %s1957_s10, %s1957_s10 }
   0xc   :  { %p1964_p6 = por %p1963_p5, %p1962_p4 }
   0xe   :  { %p1965_p7 = pnand %p1964_p6, %p1958_p3 }
  0x10   :  { %1968 = shalt.err (!%p1965_p7)
}
  0x11   :  { %s2042_s11 = smov 64   ;;  %s2043_s12 = smov 4  }
  0x12   :  { %40 = dma.hbm_to_vmem [thread:$0]  %s2253_s2, 4096, %s35_s25, [#allocation5], %s2042_s11, %s2042_s11, %s2043_s12  }
  0x13   :  { %s2044_s15 = smov [#allocation2]   ;;  %s1969_s19 = scalar_lea.hbm %s2252_s1, 8192 }
  0x14   :  { %s22_s16 = sshll.u32 %s2044_s15, 4  ;;  %p1970_p8 = scmp.ne.s32.totalorder %s2252_s1, %s1969_s19  ;;  %s23_s16 = int_to_ptr.vmem [resolvable:$true] %s22_s16 }
  0x15   :  { %p1973_p9 = scmp.lt.u32.totalorder %s1969_s19, %s2252_s1 }
  0x17   :  { %p1975_p10 = pnand %p1973_p9, %p1970_p8 }
  0x19   :  { %1978 = shalt.err (!%p1975_p10)
}
  0x1a   :  { %s1979_s24 = scalar_lea.vmem %s23_s16, 8192  ;;  %p1984_p12 = scmp.lt.s32.totalorder %s23_s16, %s23_s16 }
  0x1b   :  { %p1980_p11 = scmp.ne.s32.totalorder %s23_s16, %s1979_s24  ;;  %p1985_p13 = scmp.lt.s32.totalorder %s1979_s24, %s1979_s24 }
  0x1d   :  { %p1986_p0 = por %p1985_p13, %p1984_p12 }
  0x1f   :  { %p1987_p1 = pnand %p1986_p0, %p1980_p11 }
  0x21   :  { %1990 = shalt.err (!%p1987_p1)
}
  0x22   :  { %s2045_s2 = smov 128   ;;  %s2046_s25 = smov 8  }
  0x23   :  { %28 = dma.hbm_to_vmem [thread:$0]  %s2252_s1, 8192, %s23_s16, [#allocation3], %s2045_s2, %s2045_s2, %s2046_s25  }
  0x24   :  { %s2047_s28 = smov [#allocation6]   ;;  %s2048_s30 = smov [#allocation7]  }
  0x25   :  { %s46_s29 = sshll.u32 %s2047_s28, 4  ;;  %s58_s8 = sshll.u32 %s2048_s30, 4  ;;  %s47_s29 = int_to_ptr.vmem [resolvable:$true] %s46_s29  ;;  %s2118_s8 = int_to_ptr.vmem [resolvable:$true] %s58_s8 }
  0x26   :  { %s1991_s13 = scalar_lea.hbm %s2254_s3, 2048 }
  0x27   :  { %p1992_p2 = scmp.ne.s32.totalorder %s2254_s3, %s1991_s13  ;;  %p1995_p3 = scmp.lt.u32.totalorder %s1991_s13, %s2254_s3 }
  0x29   :  { %p1997_p4 = pnand %p1995_p3, %p1992_p2 }
  0x2b   :  { %2000 = shalt.err (!%p1997_p4)
}
  0x2c   :  { %s2001_s1 = scalar_lea.vmem %s47_s29, 2048  ;;  %p2006_p6 = scmp.lt.s32.totalorder %s47_s29, %s47_s29 }
  0x2d   :  { %p2002_p5 = scmp.ne.s32.totalorder %s47_s29, %s2001_s1  ;;  %p2007_p7 = scmp.lt.s32.totalorder %s2001_s1, %s2001_s1 }
  0x2f   :  { %p2008_p8 = por %p2007_p7, %p2006_p6 }
  0x31   :  { %p2009_p9 = pnand %p2008_p8, %p2002_p5 }
  0x33   :  { %2012 = shalt.err (!%p2009_p9)
}
  0x34   :  { %52 = dma.hbm_to_vmem [thread:$0]  %s2254_s3, 2048, %s47_s29, [#allocation5], %s2042_s11, %s2042_s11, %s2043_s12  }
  0x35   :  { %s2013_s22 = scalar_lea.hbm %s2255_s4, 2048 }
  0x36   :  { %p2014_p10 = scmp.ne.s32.totalorder %s2255_s4, %s2013_s22  ;;  %p2017_p11 = scmp.lt.u32.totalorder %s2013_s22, %s2255_s4 }
  0x38   :  { %p2019_p12 = pnand %p2017_p11, %p2014_p10 }
  0x3a   :  { %2022 = shalt.err (!%p2019_p12)
}
  0x3b   :  { %s2023_s26 = scalar_lea.vmem %s2118_s8, 2048  ;;  %p2028_p0 = scmp.lt.s32.totalorder %s2118_s8, %s2118_s8 }
  0x3c   :  { %p2024_p13 = scmp.ne.s32.totalorder %s2118_s8, %s2023_s26  ;;  %p2029_p1 = scmp.lt.s32.totalorder %s2023_s26, %s2023_s26 }
  0x3e   :  { %p2030_p2 = por %p2029_p1, %p2028_p0 }
  0x40   :  { %p2031_p3 = pnand %p2030_p2, %p2024_p13 }
  0x42   :  { %2034 = shalt.err (!%p2031_p3)
}
  0x43   :  { %64 = dma.hbm_to_vmem [thread:$0]  %s2255_s4, 2048, %s2118_s8, [#allocation8], %s2042_s11, %s2042_s11, %s2043_s12  }
  0x44   :  { %2035 = dma.done.wait [#allocation3], 8192  }
  0x45   :  { %2036 = vsyncadd [#allocation3], 4294959104 }
  0x46   :  { %2037 = dma.done.wait [#allocation5], 6144  }
  0x47   :  { %2038 = vsyncadd [#allocation5], 4294961152 }
  0x48   :  { %2039 = dma.done.wait [#allocation8], 2048  }
  0x49   :  { %2040 = vsyncadd [#allocation8], 4294965248  ;;  %v1773_v0 = vld [vmem:[#allocation2 + $0x4] ss:$8 sps:$4 sm:$0xff]   ;;  %v1775_v1 = vld [vmem:[#allocation2] ss:$8 sps:$4 sm:$0xff]  }
  0x4a   :  { %298 = vmatprep.subr.bf16.mxu0 %v1773_v0  ;;  %v1776_v2 = vld [vmem:[#allocation2 + $0x14] ss:$8 sps:$4 sm:$0xff]   ;;  %v1778_v3 = vld [vmem:[#allocation2 + $0x10] ss:$8 sps:$4 sm:$0xff]   ;;  %v1779_v4 = vld [vmem:[#allocation2 + $0x24] ss:$8 sps:$4 sm:$0xff]  }
  0x4b   :  { %299 = vmatpush1.bf16.msra.mxu0 %v1775_v1  ;;  %v1781_v5 = vld [vmem:[#allocation2 + $0x20] ss:$8 sps:$4 sm:$0xff]   ;;  %v1782_v6 = vld [vmem:[#allocation2 + $0x34] ss:$8 sps:$4 sm:$0xff]   ;;  %v1784_v7 = vld [vmem:[#allocation2 + $0x30] ss:$8 sps:$4 sm:$0xff]  }
  0x4c   :  { %300 = vmatprep.subr.bf16.mxu0 %v1776_v2  ;;  %v1785_v8 = vld [vmem:[#allocation2 + $0x44] ss:$8 sps:$4 sm:$0xff]   ;;  %v1787_v9 = vld [vmem:[#allocation2 + $0x40] ss:$8 sps:$4 sm:$0xff]   ;;  %v1788_v10 = vld [vmem:[#allocation2 + $0x54] ss:$8 sps:$4 sm:$0xff]  }
  0x4d   :  { %v1790_v11 = vld [vmem:[#allocation2 + $0x50] ss:$8 sps:$4 sm:$0xff]   ;;  %v1791_v12 = vld [vmem:[#allocation2 + $0x64] ss:$8 sps:$4 sm:$0xff]   ;;  %v1793_v14 = vld [vmem:[#allocation2 + $0x60] ss:$8 sps:$4 sm:$0xff]  }
  0x4e   :  { %v1823_v13 = vld [vmem:[%s2251_s0 + $0x4] ss:$16 sps:$4 sm:$0xff]   ;;  %v1796_v18 = vld [vmem:[#allocation2 + $0x70] ss:$8 sps:$4 sm:$0xff]   ;;  %v1832_v20 = vld [vmem:[#allocation4 + $0x48] sm:$0xff]   ;;  %vm2050_vm0 = vmmov 0  }
  0x4f   :  { %301 = vmatpush1.bf16.msra.mxu0 %v1778_v3  ;;  %v1794_v15 = vld [vmem:[#allocation2 + $0x74] ss:$8 sps:$4 sm:$0xff]   ;;  %330 = vmatprep.mubr.bf16.mxu0 %v1823_v13  ;;  %v1827_v16 = vld [vmem:[#allocation4 + $0x40] sm:$0xff]   ;;  %v1833_v21 = vld [vmem:[#allocation4 + $0x8] sm:$0xff]   ;;  %vm1459_vm1 = vcmask 64512  }
  0x50   :  { %302 = vmatprep.subr.bf16.mxu0 %v1779_v4  ;;  %v1828_v17 = vld [vmem:[#allocation4] sm:$0xff]   ;;  %1610 = vmatprep.subr.bf16.mxu1 %v1827_v16  ;;  %v1800_v23 = vld [vmem:[#allocation2 + $0x94] ss:$8 sps:$4 sm:$0xff]   ;;  %v1802_v26 = vld [vmem:[#allocation2 + $0x90] ss:$8 sps:$4 sm:$0xff]  }
  0x51   :  { %v1797_v19 = vld [vmem:[#allocation2 + $0x84] ss:$8 sps:$4 sm:$0xff]   ;;  %1611 = vmatpush3.bf16.msra.mxu1 %v1828_v17  ;;  %v1799_v22 = vld [vmem:[#allocation2 + $0x80] ss:$8 sps:$4 sm:$0xff]   ;;  %v1837_v24 = vld [vmem:[#allocation4 + $0x50] sm:$0xff]  }
  0x52   :  { %1612 = vmatprep.subr.bf16.mxu1 %v1832_v20  ;;  %v1838_v25 = vld [vmem:[#allocation4 + $0x10] sm:$0xff]   ;;  %v1842_v27 = vld [vmem:[#allocation4 + $0x58] sm:$0xff]   ;;  %v1803_v29 = vld [vmem:[#allocation2 + $0xa4] ss:$8 sps:$4 sm:$0xff]  }
  0x53   :  { %303 = vmatpush1.bf16.msra.mxu0 %v1781_v5  ;;  %v1843_v28 = vld [vmem:[#allocation4 + $0x18] sm:$0xff]   ;;  %v1805_v30 = vld [vmem:[#allocation2 + $0xa0] ss:$8 sps:$4 sm:$0xff]   ;;  %v1809_v36 = vld [vmem:[#allocation2 + $0xc4] ss:$8 sps:$4 sm:$0xff]  }
  0x54   :  { %304 = vmatprep.subr.bf16.mxu0 %v1782_v6  ;;  %v1847_v31 = vld [vmem:[#allocation4 + $0x60] sm:$0xff]   ;;  %v1806_v33 = vld [vmem:[#allocation2 + $0xb4] ss:$8 sps:$4 sm:$0xff]   ;;  %v1808_v34 = vld [vmem:[#allocation2 + $0xb0] ss:$8 sps:$4 sm:$0xff]  }
  0x55   :  { %1613 = vmatpush3.bf16.msra.mxu1 %v1833_v21  ;;  %v1848_v32 = vld [vmem:[#allocation4 + $0x20] sm:$0xff]   ;;  %v1852_v35 = vld [vmem:[#allocation4 + $0x68] sm:$0xff]   ;;  %v1812_v38 = vld [vmem:[#allocation2 + $0xd4] ss:$8 sps:$4 sm:$0xff]   ;;  %v118_v21 = vlaneseq }
  0x56   :  { %1614 = vmatprep.subr.bf16.mxu1 %v1837_v24  ;;  %v1811_v37 = vld [vmem:[#allocation2 + $0xc0] ss:$8 sps:$4 sm:$0xff]   ;;  %v1814_v39 = vld [vmem:[#allocation2 + $0xd0] ss:$8 sps:$4 sm:$0xff]   ;;  %v1815_v40 = vld [vmem:[#allocation2 + $0xe4] ss:$8 sps:$4 sm:$0xff]  }
  0x57   :  { %305 = vmatpush1.bf16.msra.mxu0 %v1784_v7  ;;  %v1817_v41 = vld [vmem:[#allocation2 + $0xe0] ss:$8 sps:$4 sm:$0xff]   ;;  %v1818_v42 = vld [vmem:[#allocation2 + $0xf4] ss:$8 sps:$4 sm:$0xff]   ;;  %v1820_v43 = vld [vmem:[#allocation2 + $0xf0] ss:$8 sps:$4 sm:$0xff]  }
  0x58   :  { %306 = vmatprep.subr.bf16.mxu0 %v1785_v8  ;;  %v1826_v44 = vld [vmem:[#allocation2 + $0x104] ss:$8 sps:$4 sm:$0xff]   ;;  %v1821_v45 = vld [vmem:[%s2251_s0] ss:$16 sps:$4 sm:$0xff]   ;;  %v1831_v47 = vld [vmem:[#allocation2 + $0x114] ss:$8 sps:$4 sm:$0xff]  }
  0x59   :  { %1615 = vmatpush3.bf16.msra.mxu1 %v1838_v25  ;;  %v1824_v46 = vld [vmem:[#allocation2 + $0x100] ss:$8 sps:$4 sm:$0xff]   ;;  %v1829_v48 = vld [vmem:[#allocation2 + $0x110] ss:$8 sps:$4 sm:$0xff]   ;;  %v1836_v49 = vld [vmem:[#allocation2 + $0x124] ss:$8 sps:$4 sm:$0xff]  }
  0x5a   :  { %1616 = vmatprep.subr.bf16.mxu1 %v1842_v27  ;;  %v1834_v50 = vld [vmem:[#allocation2 + $0x120] ss:$8 sps:$4 sm:$0xff]   ;;  %v1841_v51 = vld [vmem:[#allocation2 + $0x134] ss:$8 sps:$4 sm:$0xff]   ;;  %v1839_v52 = vld [vmem:[#allocation2 + $0x130] ss:$8 sps:$4 sm:$0xff]  }
  0x5b   :  { %307 = vmatpush1.bf16.msra.mxu0 %v1787_v9  ;;  %v1846_v53 = vld [vmem:[#allocation2 + $0x144] ss:$8 sps:$4 sm:$0xff]   ;;  %v1844_v54 = vld [vmem:[#allocation2 + $0x140] ss:$8 sps:$4 sm:$0xff]   ;;  %v1851_v55 = vld [vmem:[#allocation2 + $0x154] ss:$8 sps:$4 sm:$0xff]  }
  0x5c   :  { %308 = vmatprep.subr.bf16.mxu0 %v1788_v10  ;;  %v1849_v56 = vld [vmem:[#allocation2 + $0x150] ss:$8 sps:$4 sm:$0xff]   ;;  %v1853_v57 = vld [vmem:[#allocation4 + $0x28] sm:$0xff]   ;;  %v1861_v62 = vld [vmem:[#allocation2 + $0x174] ss:$8 sps:$4 sm:$0xff]  }
  0x5d   :  { %1617 = vmatpush3.bf16.msra.mxu1 %v1843_v28  ;;  %v1856_v58 = vld [vmem:[#allocation2 + $0x164] ss:$8 sps:$4 sm:$0xff]   ;;  %v1854_v59 = vld [vmem:[#allocation2 + $0x160] ss:$8 sps:$4 sm:$0xff]   ;;  %v1857_v60 = vld [vmem:[#allocation4 + $0x70] sm:$0xff]  }
  0x5e   :  { %1618 = vmatprep.subr.bf16.mxu1 %v1847_v31  ;;  %v1858_v61 = vld [vmem:[#allocation4 + $0x30] sm:$0xff]   ;;  %v1862_v0 = vld [vmem:[#allocation4 + $0x78] sm:$0xff]   ;;  %v1866_v2 = vld [vmem:[#allocation2 + $0x184] ss:$8 sps:$4 sm:$0xff]  }
  0x5f   :  { %309 = vmatpush1.bf16.msra.mxu0 %v1790_v11  ;;  %v1859_v63 = vld [vmem:[#allocation2 + $0x170] ss:$8 sps:$4 sm:$0xff]   ;;  %v1864_v3 = vld [vmem:[#allocation2 + $0x180] ss:$8 sps:$4 sm:$0xff]   ;;  %v1869_v4 = vld [vmem:[#allocation2 + $0x194] ss:$8 sps:$4 sm:$0xff]  }
  0x60   :  { %310 = vmatprep.subr.bf16.mxu0 %v1791_v12  ;;  %v1863_v1 = vld [vmem:[#allocation4 + $0x38] sm:$0xff]   ;;  %v1872_v6 = vld [vmem:[#allocation2 + $0x1a4] ss:$8 sps:$4 sm:$0xff]   ;;  %v1870_v7 = vld [vmem:[#allocation2 + $0x1a0] ss:$8 sps:$4 sm:$0xff]   ;;  %v2049_v12 = vmov 0.0  }
  0x61   :  { %1619 = vmatpush3.bf16.msra.mxu1 %v1848_v32  ;;  %v1867_v5 = vld [vmem:[#allocation2 + $0x190] ss:$8 sps:$4 sm:$0xff]   ;;  %v1875_v8 = vld [vmem:[#allocation2 + $0x1b4] ss:$8 sps:$4 sm:$0xff]   ;;  %v1878_v11 = vld [vmem:[#allocation2 + $0x1c4] ss:$8 sps:$4 sm:$0xff]  }
  0x62   :  { %1620 = vmatprep.subr.bf16.mxu1 %v1852_v35  ;;  %v1890_v9 = vld [vmem:[%s2251_s0 + $0xc] ss:$16 sps:$4 sm:$0xff]   ;;  %v1873_v10 = vld [vmem:[#allocation2 + $0x1b0] ss:$8 sps:$4 sm:$0xff]   ;;  %v1876_v13 = vld [vmem:[#allocation2 + $0x1c0] ss:$8 sps:$4 sm:$0xff]  }
  0x63   :  { %311 = vmatpush1.bf16.msra.mxu0 %v1793_v14  ;;  %v1881_v14 = vld [vmem:[#allocation2 + $0x1d4] ss:$8 sps:$4 sm:$0xff]   ;;  %v1884_v16 = vld [vmem:[#allocation2 + $0x1e4] ss:$8 sps:$4 sm:$0xff]   ;;  %v1882_v17 = vld [vmem:[#allocation2 + $0x1e0] ss:$8 sps:$4 sm:$0xff]  }
  0x64   :  { %312 = vmatprep.subr.bf16.mxu0 %v1794_v15  ;;  %v1879_v15 = vld [vmem:[#allocation2 + $0x1d0] ss:$8 sps:$4 sm:$0xff]   ;;  %v116_v24 = vld [vmem:[%s2257_s6] ss:$8 sm:$0x3] }
  0x65   :  { %1621 = vmatpush3.bf16.msra.mxu1 %v1853_v57  ;;  %v1888_v20 = vld [vmem:[%s2251_s0 + $0x8] ss:$16 sps:$4 sm:$0xff]  }
  0x66   :  { %1622 = vmatprep.subr.bf16.mxu1 %v1857_v60 }
  0x67   :  { %313 = vmatpush1.bf16.msra.mxu0 %v1796_v18  ;;  %v1887_v18 = vld [vmem:[#allocation2 + $0x1f4] ss:$8 sps:$4 sm:$0xff]  }
  0x68   :  { %314 = vmatprep.subr.bf16.mxu0 %v1797_v19  ;;  %v1885_v19 = vld [vmem:[#allocation2 + $0x1f0] ss:$8 sps:$4 sm:$0xff]  }
  0x69   :  { %1623 = vmatpush3.bf16.msra.mxu1 %v1858_v61 }
  0x6a   :  { %1624 = vmatprep.subr.bf16.mxu1 %v1862_v0 }
  0x6b   :  { %315 = vmatpush1.bf16.msra.mxu0 %v1799_v22  ;;  %v119_v22 = vshrl.u32 %v118_v21, 7  ;;  %v1904_v21 = vld [vmem:[#allocation4 + $0x90] sm:$0xff]  }
  0x6c   :  { %316 = vmatprep.subr.bf16.mxu0 %v1800_v23 }
  0x6d   :  { %1625 = vmatpush3.bf16.msra.mxu1 %v1863_v1  ;;  %v120_v23 = vsub.s32 0, %v119_v22  ;;  %v124_v25 = vsub.s32 1, %v119_v22  ;;  %v1905_v22 = vld [vmem:[#allocation4 + $0xd8] sm:$0xff]  }
  0x6e   :  { %1703 = vmatprep.subr.bf16.mxu1 %v2049_v12 }
  0x6f   :  { %317 = vmatpush1.bf16.msra.mxu0 %v1802_v26  ;;  %v121_v26 = vrot.slane %v116_v24, %v120_v23  ;;  %v125_v27 = vrot.slane %v116_v24, %v124_v25  ;;  %v1907_v24 = vld [vmem:[#allocation4 + $0xe0] sm:$0xff]  }
  0x70   :  { %318 = vmatprep.subr.bf16.mxu0 %v1803_v29 }
  0x73   :  { %319 = vmatpush1.bf16.msra.mxu0 %v1805_v30 }
  0x74   :  { %320 = vmatprep.subr.bf16.mxu0 %v1806_v33 }
  0x77   :  { %321 = vmatpush1.bf16.msra.mxu0 %v1808_v34 }
  0x78   :  { %322 = vmatprep.subr.bf16.mxu0 %v1809_v36 }
  0x7b   :  { %323 = vmatpush1.bf16.msra.mxu0 %v1811_v37 }
  0x7c   :  { %324 = vmatprep.subr.bf16.mxu0 %v1812_v38 }
  0x7f   :  { %325 = vmatpush1.bf16.msra.mxu0 %v1814_v39 }
  0x80   :  { %326 = vmatprep.subr.bf16.mxu0 %v1815_v40 }
  0x83   :  { %327 = vmatpush1.bf16.msra.mxu0 %v1817_v41 }
  0x84   :  { %328 = vmatprep.subr.bf16.mxu0 %v1818_v42  ;;  %v1891_v42 = vld [vmem:[#allocation6] sm:$0xff]  }
  0x87   :  { %329 = vmatpush1.bf16.msra.mxu0 %v1820_v43  ;;  %v1892_v43 = vld [vmem:[#allocation6 + $0x8] sm:$0xff]  }
  0x88   :  { %846 = vmatprep.subr.bf16.mxu0 %v1826_v44  ;;  %v1893_v44 = vld [vmem:[#allocation6 + $0x10] sm:$0xff]  }
  0x8a   :  { %331 = vmatmul.mubr.bf16.vlgmr.msra.gmra.mrb[0].mxu0 %v1821_v45  ;;  %v1894_v45 = vld [vmem:[#allocation6 + $0x18] sm:$0xff]  }
  0x8b   :  { %847 = vmatpush1.bf16.msra.mxu0 %v1824_v46  ;;  %878 = vmatprep.mubr.bf16.mxu0 %v1890_v9  ;;  %v1895_v46 = vld [vmem:[#allocation6 + $0x20] sm:$0xff]  }
  0x8c   :  { %848 = vmatprep.subr.bf16.mxu0 %v1831_v47  ;;  %v1896_v47 = vld [vmem:[#allocation6 + $0x28] sm:$0xff]  }
  0x8f   :  { %849 = vmatpush1.bf16.msra.mxu0 %v1829_v48  ;;  %v1897_v48 = vld [vmem:[#allocation6 + $0x30] sm:$0xff]  }
  0x90   :  { %850 = vmatprep.subr.bf16.mxu0 %v1836_v49  ;;  %v1898_v49 = vld [vmem:[#allocation6 + $0x38] sm:$0xff]  }
  0x93   :  { %851 = vmatpush1.bf16.msra.mxu0 %v1834_v50  ;;  %v1899_v50 = vld [vmem:[#allocation4 + $0xc0] sm:$0xff]  }
  0x94   :  { %852 = vmatprep.subr.bf16.mxu0 %v1841_v51  ;;  %v1527_v51 = vld [vmem:[%s2257_s6 + $0x1] ss:$8 sm:$0x3] }
  0x97   :  { %853 = vmatpush1.bf16.msra.mxu0 %v1839_v52 }
  0x98   :  { %854 = vmatprep.subr.bf16.mxu0 %v1846_v53  ;;  %v669_v53 = vrot.slane %v1527_v51, %v120_v23  ;;  %v1906_v23 = vld [vmem:[#allocation4 + $0x98] sm:$0xff]  }
  0x9b   :  { %855 = vmatpush1.bf16.msra.mxu0 %v1844_v54  ;;  %v673_v54 = vrot.slane %v1527_v51, %v124_v25  ;;  %v1908_v25 = vld [vmem:[#allocation4 + $0xa0] sm:$0xff]   ;;  %v1934_v51 = vld [vmem:[#allocation7 + $0x28] sm:$0xff]  }
  0x9c   :  { %856 = vmatprep.subr.bf16.mxu0 %v1851_v55 }
  0x9f   :  { %857 = vmatpush1.bf16.msra.mxu0 %v1849_v56 }
  0xa0   :  { %858 = vmatprep.subr.bf16.mxu0 %v1856_v58 }
  0xa3   :  { %859 = vmatpush1.bf16.msra.mxu0 %v1854_v59 }
  0xa4   :  { %860 = vmatprep.subr.bf16.mxu0 %v1861_v62 }
  0xa7   :  { %861 = vmatpush1.bf16.msra.mxu0 %v1859_v63 }
  0xa8   :  { %862 = vmatprep.subr.bf16.mxu0 %v1866_v2 }
  0xab   :  { %863 = vmatpush1.bf16.msra.mxu0 %v1864_v3 }
  0xac   :  { %864 = vmatprep.subr.bf16.mxu0 %v1869_v4 }
  0xaf   :  { %865 = vmatpush1.bf16.msra.mxu0 %v1867_v5  ;;  %v379_v5 = vld [vmem:[%s2257_s6 + $0x2] ss:$0 sm:$0xff] }
  0xb0   :  { %866 = vmatprep.subr.bf16.mxu0 %v1872_v6 }
  0xb3   :  { %867 = vmatpush1.bf16.msra.mxu0 %v1870_v7 }
  0xb4   :  { %868 = vmatprep.subr.bf16.mxu0 %v1875_v8 }
  0xb7   :  { %869 = vmatpush1.bf16.msra.mxu0 %v1873_v10 }
  0xb8   :  { %870 = vmatprep.subr.bf16.mxu0 %v1878_v11 }
  0xbb   :  { %871 = vmatpush1.bf16.msra.mxu0 %v1876_v13 }
  0xbc   :  { %872 = vmatprep.subr.bf16.mxu0 %v1881_v14 }
  0xbf   :  { %873 = vmatpush1.bf16.msra.mxu0 %v1879_v15 }
  0xc0   :  { %874 = vmatprep.subr.bf16.mxu0 %v1884_v16  ;;  %v1900_v16 = vld [vmem:[#allocation4 + $0x80] sm:$0xff]  }
  0xc3   :  { %875 = vmatpush1.bf16.msra.mxu0 %v1882_v17 }
  0xc4   :  { %876 = vmatprep.subr.bf16.mxu0 %v1887_v18  ;;  %v1901_v18 = vld [vmem:[#allocation4 + $0xc8] sm:$0xff]  }
  0xc7   :  { %877 = vmatpush1.bf16.msra.mxu0 %v1885_v19  ;;  %v1902_v19 = vld [vmem:[#allocation4 + $0x88] sm:$0xff]  }
  0xca   :  { %879 = vmatmul.mubr.bf16.vlgmr.msra.gmra.mrb[4].mxu0 %v1888_v20  ;;  %v1903_v20 = vld [vmem:[#allocation4 + $0xd0] sm:$0xff]  }
 0x15d   :  { %v332_v28 = vpop.f32.mrb[0].mxu0 }
 0x15e   :  { %v333_v29 = vadd.f32 %v332_v28, %v121_v26  ;;  %v334_v30 = vpop.f32.mrb[1].mxu0  ;;  %v1911_v28 = vld [vmem:[#allocation4 + $0xf0] sm:$0xff]  }
 0x15f   :  { %v335_v31 = vadd.f32 %v334_v30, %v125_v27  ;;  %v336_v32 = vpop.f32.mrb[2].mxu0  ;;  %v1913_v30 = vld [vmem:[#allocation4 + $0xf8] sm:$0xff]  }
 0x160   :  { %v337_v33 = vadd.f32 %v336_v32, %v121_v26  ;;  %v338_v34 = vpop.f32.mrb[3].mxu0  ;;  %v341_v36 = vmax.f32 %v333_v29, 0.0  ;;  %v1909_v26 = vld [vmem:[#allocation4 + $0xe8] sm:$0xff]   ;;  %v1912_v29 = vld [vmem:[#allocation4 + $0xb0] sm:$0xff]   ;;  %v1915_v32 = vld [vmem:[#allocation6 + $0x40] sm:$0xff]  }
 0x161   :  { %v339_v35 = vadd.f32 %v338_v34, %v125_v27  ;;  %v342_v38 = vmax.f32 %v335_v31, 0.0  ;;  %v1910_v27 = vld [vmem:[#allocation4 + $0xa8] sm:$0xff]   ;;  %v1914_v31 = vld [vmem:[#allocation4 + $0xb8] sm:$0xff]   ;;  %v1917_v34 = vld [vmem:[#allocation6 + $0x50] sm:$0xff]  }
 0x162   :  { %v343_v37 = vmax.f32 %v337_v33, 0.0  ;;  %v1916_v33 = vld [vmem:[#allocation6 + $0x48] sm:$0xff]  }
 0x163   :  { %v344_v39 = vmax.f32 %v339_v35, 0.0  ;;  %v1918_v35 = vld [vmem:[#allocation6 + $0x58] sm:$0xff]  }
 0x164   :  { %v345_v40 = vpack.c.bf16 %v343_v37, %v341_v36  ;;  %v1919_v36 = vld [vmem:[#allocation6 + $0x60] sm:$0xff]   ;;  %v1920_v37 = vld [vmem:[#allocation6 + $0x68] sm:$0xff]  }
 0x165   :  { %v346_v41 = vpack.c.bf16 %v344_v39, %v342_v38  ;;  %v1921_v38 = vld [vmem:[#allocation6 + $0x70] sm:$0xff]   ;;  %v1922_v39 = vld [vmem:[#allocation6 + $0x78] sm:$0xff]  }
 0x167   :  { %508 = vmatprep.mubr.bf16.mxu1 %v346_v41  ;;  %v1924_v41 = vld [vmem:[#allocation7] sm:$0xff]  }
 0x168   :  { %509 = vmatmul.mubr.bf16.vlgmr.msra.gmra.mrb[0].mxu1 %v345_v40  ;;  %v1923_v40 = vld [vmem:[#allocation7 + $0x40] sm:$0xff]  }
 0x169   :  { %1704 = vmatpush3.bf16.msra.mxu1 %v1891_v42  ;;  %1719 = vmatprep.mubr.msk.bf16.mxu1 %vm2050_vm0, %v2049_v12  ;;  %v1925_v42 = vld [vmem:[#allocation7 + $0x48] sm:$0xff]  }
 0x16a   :  { %1705 = vmatprep.subr.bf16.mxu1 %v2049_v12  ;;  %1672 = vmatprep.subr.bf16.mxu0 %v1923_v40 }
 0x16b   :  { %1673 = vmatpush3.bf16.msra.mxu0 %v1924_v41 }
 0x16c   :  { %1674 = vmatprep.subr.bf16.mxu0 %v1925_v42 }
 0x16d   :  { %1706 = vmatpush3.bf16.msra.mxu1 %v1892_v43  ;;  %v1926_v43 = vld [vmem:[#allocation7 + $0x8] sm:$0xff]  }
 0x16e   :  { %1707 = vmatprep.subr.bf16.mxu1 %v2049_v12 }
 0x16f   :  { %1675 = vmatpush3.bf16.msra.mxu0 %v1926_v43 }
 0x171   :  { %1708 = vmatpush3.bf16.msra.mxu1 %v1893_v44  ;;  %v1927_v44 = vld [vmem:[#allocation7 + $0x50] sm:$0xff]  }
 0x172   :  { %1709 = vmatprep.subr.bf16.mxu1 %v2049_v12  ;;  %1676 = vmatprep.subr.bf16.mxu0 %v1927_v44  ;;  %v1369_v44 = vld [vmem:[%s2257_s6 + $0x7] ss:$0 sm:$0xff] }
 0x175   :  { %1710 = vmatpush3.bf16.msra.mxu1 %v1894_v45  ;;  %v1928_v45 = vld [vmem:[#allocation7 + $0x10] sm:$0xff]  }
 0x176   :  { %1711 = vmatprep.subr.bf16.mxu1 %v2049_v12  ;;  %1677 = vmatpush3.bf16.msra.mxu0 %v1928_v45 }
 0x179   :  { %1712 = vmatpush3.bf16.msra.mxu1 %v1895_v46  ;;  %v1929_v46 = vld [vmem:[#allocation7 + $0x58] sm:$0xff]  }
 0x17a   :  { %1713 = vmatprep.subr.bf16.mxu1 %v2049_v12  ;;  %1678 = vmatprep.subr.bf16.mxu0 %v1929_v46 }
 0x17d   :  { %1714 = vmatpush3.bf16.msra.mxu1 %v1896_v47  ;;  %v1930_v47 = vld [vmem:[#allocation7 + $0x18] sm:$0xff]  }
 0x17e   :  { %1715 = vmatprep.subr.bf16.mxu1 %v2049_v12  ;;  %1679 = vmatpush3.bf16.msra.mxu0 %v1930_v47 }
 0x181   :  { %1716 = vmatpush3.bf16.msra.mxu1 %v1897_v48  ;;  %v1931_v48 = vld [vmem:[#allocation7 + $0x60] sm:$0xff]  }
 0x182   :  { %1717 = vmatprep.subr.bf16.mxu1 %v2049_v12  ;;  %1680 = vmatprep.subr.bf16.mxu0 %v1931_v48 }
 0x185   :  { %1718 = vmatpush3.bf16.msra.mxu1 %v1898_v49  ;;  %v1932_v49 = vld [vmem:[#allocation7 + $0x20] sm:$0xff]  }
 0x186   :  { %1641 = vmatprep.subr.bf16.mxu1 %v1899_v50  ;;  %v1933_v50 = vld [vmem:[#allocation7 + $0x68] sm:$0xff]   ;;  %1681 = vmatpush3.bf16.msra.mxu0 %v1932_v49 }
 0x187   :  { %1682 = vmatprep.subr.bf16.mxu0 %v1933_v50 }
 0x18a   :  { %1683 = vmatpush3.bf16.msra.mxu0 %v1934_v51 }
 0x19d   :  { %v880_v52 = vpop.f32.mrb[4].mxu0 }
 0x19e   :  { %v882_v55 = vpop.f32.mrb[5].mxu0  ;;  %v881_v57 = vadd.f32 %v880_v52, %v669_v53  ;;  %v536_v52 = vld [vmem:[%s2257_s6 + $0x4] ss:$0 sm:$0xff] }
 0x19f   :  { %v884_v56 = vpop.f32.mrb[6].mxu0  ;;  %v883_v58 = vadd.f32 %v882_v55, %v673_v54 }
 0x1a0   :  { %v885_v59 = vadd.f32 %v884_v56, %v669_v53  ;;  %v886_v60 = vpop.f32.mrb[7].mxu0  ;;  %v889_v62 = vmax.f32 %v881_v57, 0.0 }
 0x1a1   :  { %v887_v61 = vadd.f32 %v886_v60, %v673_v54  ;;  %v890_v63 = vmax.f32 %v883_v58, 0.0 }
 0x1a2   :  { %v891_v0 = vmax.f32 %v885_v59, 0.0 }
 0x1a3   :  { %v892_v1 = vmax.f32 %v887_v61, 0.0 }
 0x1a4   :  { %v893_v2 = vpack.c.bf16 %v891_v0, %v889_v62 }
 0x1a5   :  { %v894_v3 = vpack.c.bf16 %v892_v1, %v890_v63  ;;  %v928_v63 = vld [vmem:[%s2257_s6 + $0x3] ss:$0 sm:$0xff] }
 0x23b   :  { %v1626_v4 = vpop.f32.mrb[0].mxu1 }
 0x23c   :  { %v1627_v6 = vpop.f32.mrb[1].mxu1 }
 0x23d   :  { %v1628_v7 = vadd.f32 %v1627_v6, %v1626_v4  ;;  %v1629_v8 = vpop.f32.mrb[2].mxu1 }
 0x23e   :  { %v1630_v9 = vpop.f32.mrb[3].mxu1 }
 0x23f   :  { %v511_v10 = vadd.f32 %v1628_v7, %v379_v5  ;;  %v1631_v11 = vadd.f32 %v1630_v9, %v1629_v8 }
 0x241   :  { %v514_v13 = vadd.f32 %v1631_v11, %v379_v5  ;;  %v517_v14 = vmax.f32 %v511_v10, 0.0  ;;  %v1935_v10 = vld [vmem:[#allocation7 + $0x70] sm:$0xff]  }
 0x242   :  { %v1936_v11 = vld [vmem:[#allocation7 + $0x30] sm:$0xff]   ;;  %1684 = vmatprep.subr.bf16.mxu0 %v1935_v10 }
 0x243   :  { %v518_v15 = vmax.f32 %v514_v13, 0.0  ;;  %1685 = vmatpush3.bf16.msra.mxu0 %v1936_v11  ;;  %v1937_v13 = vld [vmem:[#allocation7 + $0x78] sm:$0xff]  }
 0x244   :  { %1686 = vmatprep.subr.bf16.mxu0 %v1937_v13 }
 0x245   :  { %v519_v17 = vpack.c.bf16 %v518_v15, %v517_v14  ;;  %v1938_v14 = vld [vmem:[#allocation7 + $0x38] sm:$0xff]   ;;  %v1939_v15 = vld [vmem:[%s2256_s5] sm:$0xff]  }
 0x247   :  { %1720 = vmatmul.mubr.bf16.vlgmr.msra.gmra.mrb[4].mxu1 %v519_v17  ;;  %1687 = vmatpush3.bf16.msra.mxu0 %v1938_v14  ;;  %v1941_v17 = vld [vmem:[%s2256_s5 + $0x10] sm:$0xff]  }
 0x248   :  { %1642 = vmatpush3.bf16.msra.mxu1 %v1900_v16  ;;  %1057 = vmatprep.mubr.bf16.mxu1 %v894_v3  ;;  %v1940_v16 = vld [vmem:[%s2256_s5 + $0x8] sm:$0xff]  }
 0x249   :  { %1643 = vmatprep.subr.bf16.mxu1 %v1901_v18  ;;  %v1942_v18 = vld [vmem:[%s2256_s5 + $0x18] sm:$0xff]  }
 0x24c   :  { %1644 = vmatpush3.bf16.msra.mxu1 %v1902_v19  ;;  %v1943_v19 = vld [vmem:[%s2256_s5 + $0x20] sm:$0xff]  }
 0x24d   :  { %1645 = vmatprep.subr.bf16.mxu1 %v1903_v20  ;;  %v1086_v20 = vld [vmem:[%s2257_s6 + $0x5] ss:$0 sm:$0xff] }
 0x250   :  { %1646 = vmatpush3.bf16.msra.mxu1 %v1904_v21 }
 0x251   :  { %1647 = vmatprep.subr.bf16.mxu1 %v1905_v22 }
 0x254   :  { %1648 = vmatpush3.bf16.msra.mxu1 %v1906_v23 }
 0x255   :  { %1649 = vmatprep.subr.bf16.mxu1 %v1907_v24 }
 0x258   :  { %1650 = vmatpush3.bf16.msra.mxu1 %v1908_v25 }
 0x259   :  { %1651 = vmatprep.subr.bf16.mxu1 %v1909_v26 }
 0x25c   :  { %1652 = vmatpush3.bf16.msra.mxu1 %v1910_v27 }
 0x25d   :  { %1653 = vmatprep.subr.bf16.mxu1 %v1911_v28 }
 0x260   :  { %1654 = vmatpush3.bf16.msra.mxu1 %v1912_v29 }
 0x261   :  { %1655 = vmatprep.subr.bf16.mxu1 %v1913_v30  ;;  %v1944_v30 = vld [vmem:[%s2256_s5 + $0x28] sm:$0xff]  }
 0x264   :  { %1656 = vmatpush3.bf16.msra.mxu1 %v1914_v31  ;;  %v1945_v31 = vld [vmem:[%s2256_s5 + $0x30] sm:$0xff]  }
 0x265   :  { %1723 = vmatprep.subr.bf16.mxu1 %v2049_v12 }
 0x267   :  { %1058 = vmatmul.mubr.bf16.vlgmr.msra.gmra.mrb[8].mxu1 %v893_v2 }
 0x268   :  { %1739 = vmatprep.mubr.msk.bf16.mxu1 %vm2050_vm0, %v2049_v12  ;;  %1724 = vmatpush3.bf16.msra.mxu1 %v1915_v32  ;;  %v1946_v32 = vld [vmem:[%s2256_s5 + $0x38] sm:$0xff]  }
 0x269   :  { %1725 = vmatprep.subr.bf16.mxu1 %v2049_v12 }
 0x26c   :  { %1726 = vmatpush3.bf16.msra.mxu1 %v1916_v33 }
 0x26d   :  { %1727 = vmatprep.subr.bf16.mxu1 %v2049_v12 }
 0x270   :  { %1728 = vmatpush3.bf16.msra.mxu1 %v1917_v34  ;;  %v1212_v34 = vld [vmem:[%s2257_s6 + $0x6] ss:$0 sm:$0xff] }
 0x271   :  { %1729 = vmatprep.subr.bf16.mxu1 %v2049_v12 }
 0x274   :  { %1730 = vmatpush3.bf16.msra.mxu1 %v1918_v35 }
 0x275   :  { %1731 = vmatprep.subr.bf16.mxu1 %v2049_v12 }
 0x278   :  { %1732 = vmatpush3.bf16.msra.mxu1 %v1919_v36 }
 0x279   :  { %1733 = vmatprep.subr.bf16.mxu1 %v2049_v12 }
 0x27c   :  { %1734 = vmatpush3.bf16.msra.mxu1 %v1920_v37 }
 0x27d   :  { %1735 = vmatprep.subr.bf16.mxu1 %v2049_v12 }
 0x280   :  { %1736 = vmatpush3.bf16.msra.mxu1 %v1921_v38 }
 0x281   :  { %1737 = vmatprep.subr.bf16.mxu1 %v2049_v12 }
 0x284   :  { %1738 = vmatpush3.bf16.msra.mxu1 %v1922_v39 }
 0x285   :  { %1743 = vmatprep.subr.bf16.mxu1 %v2049_v12 }
 0x31a   :  { %v619_v53 = vpop.f32.mrb[4].mxu1 }
 0x31b   :  { %v620_v54 = vadd.f32 %v619_v53, %v536_v52  ;;  %v1721_v55 = vpop.f32.mrb[5].mxu1 }
 0x31c   :  { %v622_v56 = vpop.f32.mrb[6].mxu1 }
 0x31d   :  { %v623_v57 = vadd.f32 %v622_v56, %v536_v52  ;;  %v1722_v58 = vpop.f32.mrb[7].mxu1  ;;  %v626_v59 = vmax.f32 %v620_v54, 0.0 }
 0x31f   :  { %v627_v60 = vmax.f32 %v623_v57, 0.0 }
 0x321   :  { %v1178_v61 = vpack.c.bf16 %v627_v60, %v626_v59 }
 0x33a   :  { %v1657_v62 = vpop.f32.mrb[8].mxu1 }
 0x33b   :  { %v1658_v0 = vpop.f32.mrb[9].mxu1 }
 0x33c   :  { %v1659_v1 = vadd.f32 %v1658_v0, %v1657_v62  ;;  %v1660_v2 = vpop.f32.mrb[10].mxu1 }
 0x33d   :  { %v1661_v3 = vpop.f32.mrb[11].mxu1 }
 0x33e   :  { %v1060_v4 = vadd.f32 %v1659_v1, %v928_v63  ;;  %v1662_v5 = vadd.f32 %v1661_v3, %v1660_v2 }
 0x340   :  { %v1063_v6 = vadd.f32 %v1662_v5, %v928_v63  ;;  %v1066_v7 = vmax.f32 %v1060_v4, 0.0 }
 0x342   :  { %v1067_v8 = vmax.f32 %v1063_v6, 0.0 }
 0x344   :  { %v1068_v9 = vpack.c.bf16 %v1067_v8, %v1066_v7 }
 0x346   :  { %1740 = vmatmul.mubr.bf16.vlgmr.msra.gmra.mrb[12].mxu1 %v1068_v9 }
 0x347   :  { %1759 = vmatprep.mubr.msk.bf16.mxu1 %vm2050_vm0, %v2049_v12  ;;  %1744 = vmatpush3.bf16.msra.mxu1 %v1939_v15 }
 0x348   :  { %1745 = vmatprep.subr.bf16.mxu1 %v2049_v12 }
 0x34b   :  { %1746 = vmatpush3.bf16.msra.mxu1 %v1940_v16 }
 0x34c   :  { %1747 = vmatprep.subr.bf16.mxu1 %v2049_v12 }
 0x34f   :  { %1748 = vmatpush3.bf16.msra.mxu1 %v1941_v17 }
 0x350   :  { %1749 = vmatprep.subr.bf16.mxu1 %v2049_v12 }
 0x353   :  { %1750 = vmatpush3.bf16.msra.mxu1 %v1942_v18 }
 0x354   :  { %1751 = vmatprep.subr.bf16.mxu1 %v2049_v12 }
 0x357   :  { %1752 = vmatpush3.bf16.msra.mxu1 %v1943_v19 }
 0x358   :  { %1753 = vmatprep.subr.bf16.mxu1 %v2049_v12 }
 0x35b   :  { %1754 = vmatpush3.bf16.msra.mxu1 %v1944_v30 }
 0x35c   :  { %1755 = vmatprep.subr.bf16.mxu1 %v2049_v12 }
 0x35f   :  { %1756 = vmatpush3.bf16.msra.mxu1 %v1945_v31 }
 0x360   :  { %1757 = vmatprep.subr.bf16.mxu1 %v2049_v12 }
 0x363   :  { %1758 = vmatpush3.bf16.msra.mxu1 %v1946_v32 }
 0x419   :  { %v1169_v21 = vpop.f32.mrb[12].mxu1 }
 0x41a   :  { %v1170_v22 = vadd.f32 %v1169_v21, %v1086_v20  ;;  %v1741_v23 = vpop.f32.mrb[13].mxu1 }
 0x41b   :  { %v1172_v24 = vpop.f32.mrb[14].mxu1 }
 0x41c   :  { %v1173_v25 = vadd.f32 %v1172_v24, %v1086_v20  ;;  %v1742_v26 = vpop.f32.mrb[15].mxu1  ;;  %v1176_v27 = vmax.f32 %v1170_v22, 0.0 }
 0x41e   :  { %v1177_v28 = vmax.f32 %v1173_v25, 0.0 }
 0x420   :  { %v1179_v29 = vpack.c.bf16 %v1177_v28, %v1176_v27 }
 0x422   :  { %1341 = vmatprep.mubr.bf16.mxu0 %v1179_v29 }
 0x423   :  { %1342 = vmatmul.mubr.bf16.vlgmr.msra.gmra.mrb[8].mxu0 %v1178_v61 }
 0x4f6   :  { %v1688_v33 = vpop.f32.mrb[8].mxu0 }
 0x4f7   :  { %v1689_v35 = vpop.f32.mrb[9].mxu0 }
 0x4f8   :  { %v1690_v36 = vadd.f32 %v1689_v35, %v1688_v33  ;;  %v1691_v37 = vpop.f32.mrb[10].mxu0 }
 0x4f9   :  { %v1692_v38 = vpop.f32.mrb[11].mxu0 }
 0x4fa   :  { %v1344_v39 = vadd.f32 %v1690_v36, %v1212_v34  ;;  %v1693_v40 = vadd.f32 %v1692_v38, %v1691_v37 }
 0x4fc   :  { %v1347_v41 = vadd.f32 %v1693_v40, %v1212_v34  ;;  %v1350_v42 = vmax.f32 %v1344_v39, 0.0 }
 0x4fe   :  { %v1351_v43 = vmax.f32 %v1347_v41, 0.0 }
 0x500   :  { %v1352_v12 = vpack.c.bf16 %v1351_v43, %v1350_v42 }
 0x502   :  { %1760 = vmatmul.mubr.bf16.vlgmr.msra.gmra.mrb[16].mxu1 %v1352_v12 }
 0x5d5   :  { %v1452_v45 = vpop.f32.mrb[16].mxu1 }
 0x5d6   :  { %v1453_v46 = vadd.f32 %v1452_v45, %v1369_v44  ;;  %v1761_v47 = vpop.f32.mrb[17].mxu1 }
 0x5d7   :  { %v1455_v48 = vpop.f32.mrb[18].mxu1 }
 0x5d8   :  { %1460 = vst.msk [vmem:[%s2258_s7] sm:$0xff] %vm1459_vm1, %v1453_v46  ;;  %v1456_v49 = vadd.f32 %v1455_v48, %v1369_v44  ;;  %v1762_v50 = vpop.f32.mrb[19].mxu1 }
 0x5da   :  { %1461 = vst.msk [vmem:[%s2258_s7 + $0x8] sm:$0xff] %vm1459_vm1, %v1456_v49 }
 0x5db   :  { %1466 = vsyncpa [#allocation3], 1 }
 0x5dc   :  { %1467 = vsyncpa [#allocation5], 1 }
 0x5dd   :  { %1468 = vsyncpa [#allocation8], 1 }

</bundles_post_ra>
